<compile_context>
chip_gen: v5e
topology: v5e:2x2
jax: 0.10.0
libtpu: 0.0.40
codegen_flags: <defaults>
</compile_context>

<pallas_src>
import functools

import jax
import jax.numpy as jnp
from jax.experimental import pallas as pl
from jax.experimental.pallas import tpu as pltpu

LANE = 128      # channel (lane) padding granularity
SUBLANE = 8     # sequence (sublane) padding granularity


def _round_up(n, m):
    return ((n + m - 1) // m) * m


# ----------------------------- Pallas kernel --------------------------------

def _temporal_block_kernel(x_ref, w1_ref, b1_ref, w2_ref, b2_ref, *rest,
                           K, dil, has_down):
    """Fused TemporalBlock: relu(relu(conv2(relu(conv1(x)))) + res)."""
    if has_down:
        wd_ref, bd_ref, o_ref = rest
    else:
        (o_ref,) = rest

    x = x_ref[0].astype(jnp.float32)          # (Lp, Cin_p)
    Lp = x.shape[0]

    def causal_conv(v, w_ref, b_ref):
        # out[t] = sum_{j=0..K-1} v[t - j*dil] @ W_j + b, with v[<0] == 0.
        # Equivalent to Conv1d(padding=(K-1)*dil, dilation=dil) + Chomp1d.
        taps = [v]
        for j in range(1, K):
            s = j * dil
            if s >= Lp:
                taps.append(jnp.zeros_like(v))
            else:
                taps.append(jnp.concatenate(
                    [jnp.zeros((s,) + v.shape[1:], v.dtype), v[:Lp - s]],
                    axis=0))
        stacked = jnp.concatenate(taps, axis=-1) if K > 1 else taps[0]
        acc = jnp.dot(stacked, w_ref[...], preferred_element_type=jnp.float32)
        return acc + b_ref[0][None, :]

    # conv1 -> relu1 -> dropout1 (identity, eval mode)
    h = jnp.maximum(causal_conv(x, w1_ref, b1_ref), 0.0)
    # conv2 -> relu2 -> dropout2 (identity, eval mode)
    out = jnp.maximum(causal_conv(h, w2_ref, b2_ref), 0.0)
    # residual path (1x1 conv if channel count changes)
    if has_down:
        res = jnp.dot(x, wd_ref[...], preferred_element_type=jnp.float32)
        res = res + bd_ref[0][None, :]
    else:
        res = x
    o_ref[0] = jnp.maximum(out + res, 0.0).astype(o_ref.dtype)


# ------------------------------ JAX wrappers ---------------------------------

def temporal_block(x, params, dilation):
    """One fused TemporalBlock.  x: (B, Lp, Cin_p) padded -> (B, Lp, Cout_p)."""
    B, Lp, Cin_p = x.shape
    K = params["K"]
    w1, b1, w2, b2 = params["w1"], params["b1"], params["w2"], params["b2"]
    Cout_p = w1.shape[1]
    has_down = params["wd"] is not None

    kern = functools.partial(_temporal_block_kernel, K=K, dil=dilation,
                             has_down=has_down)

    in_specs = [
        pl.BlockSpec((1, Lp, Cin_p), lambda b: (b, 0, 0)),       # x
        pl.BlockSpec((K * Cin_p, Cout_p), lambda b: (0, 0)),     # w1 (stacked)
        pl.BlockSpec((1, Cout_p), lambda b: (0, 0)),             # b1
        pl.BlockSpec((K * Cout_p, Cout_p), lambda b: (0, 0)),    # w2 (stacked)
        pl.BlockSpec((1, Cout_p), lambda b: (0, 0)),             # b2
    ]
    args = [x, w1, b1, w2, b2]
    if has_down:
        in_specs += [
            pl.BlockSpec((Cin_p, Cout_p), lambda b: (0, 0)),     # wd (1x1)
            pl.BlockSpec((1, Cout_p), lambda b: (0, 0)),         # bd
        ]
        args += [params["wd"], params["bd"]]

    return pl.pallas_call(
        kern,
        out_shape=jax.ShapeDtypeStruct((B, Lp, Cout_p), x.dtype),
        grid=(B,),
        in_specs=in_specs,
        out_specs=pl.BlockSpec((1, Lp, Cout_p), lambda b: (b, 0, 0)),
        compiler_params=pltpu.CompilerParams(
            dimension_semantics=("parallel",)),
    )(*args)


def prepare_block_params(w1, b1, w2, b2, wd, bd, lane=LANE):
    """Pad channels to `lane` multiples and stack the K taps along contraction.

    Weight layout: w1/w2 are (K, Cin, Cout) in *delay order*: tap j multiplies
    x[t - j*dilation].  (A PyTorch Conv1d weight of shape (Cout, Cin, K) maps
    to this as w_torch[:, :, K-1-j].T for tap j.)
    """
    K, Cin, Cout = w1.shape
    Cin_p, Cout_p = _round_up(Cin, lane), _round_up(Cout, lane)

    def pad_w(w, cin, cin_p, cout, cout_p):
        w = jnp.pad(w, ((0, 0), (0, cin_p - cin), (0, cout_p - cout)))
        return w.reshape(w.shape[0] * cin_p, cout_p)

    def pad_b(b, cout, cout_p):
        return jnp.pad(b, (0, cout_p - cout)).reshape(1, cout_p)

    p = {
        "K": K,
        "Cout": Cout,
        "w1": pad_w(w1, Cin, Cin_p, Cout, Cout_p),
        "b1": pad_b(b1, Cout, Cout_p),
        "w2": pad_w(w2, Cout, Cout_p, Cout, Cout_p),
        "b2": pad_b(b2, Cout, Cout_p),
        "wd": None,
        "bd": None,
    }
    if wd is not None:
        p["wd"] = jnp.pad(wd, ((0, Cin_p - Cin), (0, Cout_p - Cout)))
        p["bd"] = pad_b(bd, Cout, Cout_p)
    return p


def temporal_conv_net(x_ncl, prepared_params):
    """x_ncl: (B, C, L) like PyTorch.  Returns (B, C_last, L)."""
    B, C, L = x_ncl.shape
    Lp = _round_up(L, SUBLANE)
    Cp = _round_up(C, LANE)
    out = jnp.transpose(x_ncl, (0, 2, 1))                    # -> (B, L, C)
    # One-time entry padding to a lane/sublane-dense layout (padded channels
    # stay exactly zero through the whole net; padded rows are sliced off).
    out = jnp.pad(out, ((0, 0), (0, Lp - L), (0, Cp - C)))
    for i, params in enumerate(prepared_params):
        out = temporal_block(out, params, dilation=2 ** i)
    C_last = prepared_params[-1]["Cout"]
    out = out[:, :L, :C_last]
    return jnp.transpose(out, (0, 2, 1))                     # -> (B, C_last, L)


# -------------------------- synthetic parameters -----------------------------

def init_tcn_params(key, num_inputs, num_channels, kernel_size=2):
    """Deterministic synthetic parameters (shapes match the PyTorch module)."""
    params = []
    for i, out_ch in enumerate(num_channels):
        in_ch = num_inputs if i == 0 else num_channels[i - 1]
        key, k1, k2, k3, k4, k5, k6 = jax.random.split(key, 7)
        # conv weights stored as (K, Cin, Cout) in delay order (see prepare_*).
        w1 = jax.random.normal(k1, (kernel_size, in_ch, out_ch), jnp.float32) * 0.3
        b1 = jax.random.normal(k2, (out_ch,), jnp.float32) * 0.1
        w2 = jax.random.normal(k3, (kernel_size, out_ch, out_ch), jnp.float32) * 0.3
        b2 = jax.random.normal(k4, (out_ch,), jnp.float32) * 0.1
        if in_ch != out_ch:
            wd = jax.random.normal(k5, (in_ch, out_ch), jnp.float32) * 0.3
            bd = jax.random.normal(k6, (out_ch,), jnp.float32) * 0.1
        else:
            wd, bd = None, None
        params.append({"w1": w1, "b1": b1, "w2": w2, "b2": b2, "wd": wd, "bd": bd})
    return params


# ----------------------- pure-JAX reference (check) ---------------------------

def _ref_causal_conv(x_blc, w_kio, b, dil):
    B, L, _ = x_blc.shape
    K = w_kio.shape[0]
    out = jnp.zeros((B, L, w_kio.shape[2]), jnp.float32) + b
    for j in range(K):
        s = j * dil
        xs = jnp.pad(x_blc, ((0, 0), (s, 0), (0, 0)))[:, :L, :]
        out = out + jnp.einsum("blc,co->blo", xs, w_kio[j])
    return out


def _ref_tcn(x_ncl, raw_params):
    out = jnp.transpose(x_ncl, (0, 2, 1))
    for i, rp in enumerate(raw_params):
        dil = 2 ** i
        h = jax.nn.relu(_ref_causal_conv(out, rp["w1"], rp["b1"], dil))
        o = jax.nn.relu(_ref_causal_conv(h, rp["w2"], rp["b2"], dil))
        if rp["wd"] is None:
            res = out
        else:
            res = jnp.einsum("blc,co->blo", out, rp["wd"]) + rp["bd"]
        out = jax.nn.relu(o + res)
    return jnp.transpose(out, (0, 2, 1))


if __name__ == "__main__":
    key = jax.random.PRNGKey(0)
    key, xk = jax.random.split(key)

    B, num_inputs, L = 2, 4, 16
    num_channels = [8, 8]        # two TemporalBlocks, dilations 1 and 2
    kernel_size = 2

    x = jax.random.normal(xk, (B, num_inputs, L), jnp.float32)   # NCL like PyTorch
    raw_params = init_tcn_params(key, num_inputs, num_channels, kernel_size)
    params = [prepare_block_params(**rp) for rp in raw_params]

    out = temporal_conv_net(x, params)
    out = jax.block_until_ready(out)
    assert out.shape == (B, num_channels[-1], L), out.shape

    ref = jax.block_until_ready(_ref_tcn(x, raw_params))
    assert bool(jnp.allclose(out, ref, rtol=1e-5, atol=1e-4)), (
        float(jnp.max(jnp.abs(out - ref))))

    print("KERNEL_OK")
</pallas_src>

<mosaic_0001>
module attributes {stable_mosaic.version = 11 : i64} {
  func.func @_temporal_block_kernel(%arg0: i32, %arg1: memref<1x16x128xf32, #tpu.memory_space<vmem>>, %arg2: memref<256x128xf32, #tpu.memory_space<vmem>>, %arg3: memref<1x128xf32, #tpu.memory_space<vmem>>, %arg4: memref<256x128xf32, #tpu.memory_space<vmem>>, %arg5: memref<1x128xf32, #tpu.memory_space<vmem>>, %arg6: memref<128x128xf32, #tpu.memory_space<vmem>>, %arg7: memref<1x128xf32, #tpu.memory_space<vmem>>, %arg8: memref<1x16x128xf32, #tpu.memory_space<vmem>>) attributes {dimension_semantics = [#tpu.dimension_semantics<parallel>], iteration_bounds = array<i64: 2>, scalar_prefetch = 0 : i64, scratch_operands = 0 : i64, tpu.core_type = #tpu.core_type<tc>, window_params = [{transform_indices = @transform_0, window_bounds = array<i64: 1, 16, 128>}, {pipeline_mode = #tpu.pipeline_mode<synchronous>, transform_indices = @transform_1, window_bounds = array<i64: 256, 128>}, {pipeline_mode = #tpu.pipeline_mode<synchronous>, transform_indices = @transform_2, window_bounds = array<i64: 1, 128>}, {pipeline_mode = #tpu.pipeline_mode<synchronous>, transform_indices = @transform_3, window_bounds = array<i64: 256, 128>}, {pipeline_mode = #tpu.pipeline_mode<synchronous>, transform_indices = @transform_4, window_bounds = array<i64: 1, 128>}, {pipeline_mode = #tpu.pipeline_mode<synchronous>, transform_indices = @transform_5, window_bounds = array<i64: 128, 128>}, {pipeline_mode = #tpu.pipeline_mode<synchronous>, transform_indices = @transform_6, window_bounds = array<i64: 1, 128>}, {transform_indices = @transform_7, window_bounds = array<i64: 1, 16, 128>}]} {
    %c0 = arith.constant 0 : index
    %c0_0 = arith.constant 0 : index
    %c0_1 = arith.constant 0 : index
    %0 = vector.load %arg1[%c0, %c0_0, %c0_1] : memref<1x16x128xf32, #tpu.memory_space<vmem>>, vector<1x16x128xf32>
    %1 = vector.shape_cast %0 : vector<1x16x128xf32> to vector<16x128xf32>
    %cst = arith.constant 0.000000e+00 : f32
    %2 = vector.broadcast %cst : f32 to vector<1x128xf32>
    %3 = vector.extract_strided_slice %1 {offsets = [0, 0], sizes = [15, 128], strides = [1, 1]} : vector<16x128xf32> to vector<15x128xf32>
    %4 = tpu.concatenate %2, %3 in 0 : vector<1x128xf32>, vector<15x128xf32> -> vector<16x128xf32>
    %5 = tpu.concatenate %1, %4 in 1 : vector<16x128xf32>, vector<16x128xf32> -> vector<16x256xf32>
    %c0_2 = arith.constant 0 : index
    %c0_3 = arith.constant 0 : index
    %6 = vector.load %arg2[%c0_2, %c0_3] : memref<256x128xf32, #tpu.memory_space<vmem>>, vector<256x128xf32>
    %cst_4 = arith.constant dense<0.000000e+00> : vector<16x128xf32>
    %7 = tpu.matmul %5, %6, %cst_4 {dimension_numbers = #tpu.dot_dimension_numbers<[1], [0], [0], [1], [0, 0, 1, 1], [], []>} : vector<16x256xf32>, vector<256x128xf32>, vector<16x128xf32> -> vector<16x128xf32>
    %c0_5 = arith.constant 0 : index
    %c0_6 = arith.constant 0 : index
    %8 = vector.load %arg3[%c0_5, %c0_6] : memref<1x128xf32, #tpu.memory_space<vmem>>, vector<1x128xf32>
    %9 = vector.shape_cast %8 : vector<1x128xf32> to vector<128xf32>
    %10 = vector.shape_cast %9 : vector<128xf32> to vector<1x128xf32>
    %11 = vector.broadcast %10 : vector<1x128xf32> to vector<16x128xf32>
    %12 = arith.addf %7, %11 : vector<16x128xf32>
    %cst_7 = arith.constant 0.000000e+00 : f32
    %13 = vector.broadcast %cst_7 : f32 to vector<16x128xf32>
    %14 = arith.maximumf %12, %13 : vector<16x128xf32>
    %cst_8 = arith.constant 0.000000e+00 : f32
    %15 = vector.broadcast %cst_8 : f32 to vector<1x128xf32>
    %16 = vector.extract_strided_slice %14 {offsets = [0, 0], sizes = [15, 128], strides = [1, 1]} : vector<16x128xf32> to vector<15x128xf32>
    %17 = tpu.concatenate %15, %16 in 0 : vector<1x128xf32>, vector<15x128xf32> -> vector<16x128xf32>
    %18 = tpu.concatenate %14, %17 in 1 : vector<16x128xf32>, vector<16x128xf32> -> vector<16x256xf32>
    %c0_9 = arith.constant 0 : index
    %c0_10 = arith.constant 0 : index
    %19 = vector.load %arg4[%c0_9, %c0_10] : memref<256x128xf32, #tpu.memory_space<vmem>>, vector<256x128xf32>
    %cst_11 = arith.constant dense<0.000000e+00> : vector<16x128xf32>
    %20 = tpu.matmul %18, %19, %cst_11 {dimension_numbers = #tpu.dot_dimension_numbers<[1], [0], [0], [1], [0, 0, 1, 1], [], []>} : vector<16x256xf32>, vector<256x128xf32>, vector<16x128xf32> -> vector<16x128xf32>
    %c0_12 = arith.constant 0 : index
    %c0_13 = arith.constant 0 : index
    %21 = vector.load %arg5[%c0_12, %c0_13] : memref<1x128xf32, #tpu.memory_space<vmem>>, vector<1x128xf32>
    %22 = vector.shape_cast %21 : vector<1x128xf32> to vector<128xf32>
    %23 = vector.shape_cast %22 : vector<128xf32> to vector<1x128xf32>
    %24 = vector.broadcast %23 : vector<1x128xf32> to vector<16x128xf32>
    %25 = arith.addf %20, %24 : vector<16x128xf32>
    %cst_14 = arith.constant 0.000000e+00 : f32
    %26 = vector.broadcast %cst_14 : f32 to vector<16x128xf32>
    %27 = arith.maximumf %25, %26 : vector<16x128xf32>
    %c0_15 = arith.constant 0 : index
    %c0_16 = arith.constant 0 : index
    %28 = vector.load %arg6[%c0_15, %c0_16] : memref<128x128xf32, #tpu.memory_space<vmem>>, vector<128x128xf32>
    %cst_17 = arith.constant dense<0.000000e+00> : vector<16x128xf32>
    %29 = tpu.matmul %1, %28, %cst_17 {dimension_numbers = #tpu.dot_dimension_numbers<[1], [0], [0], [1], [0, 0, 1, 1], [], []>} : vector<16x128xf32>, vector<128x128xf32>, vector<16x128xf32> -> vector<16x128xf32>
    %c0_18 = arith.constant 0 : index
    %c0_19 = arith.constant 0 : index
    %30 = vector.load %arg7[%c0_18, %c0_19] : memref<1x128xf32, #tpu.memory_space<vmem>>, vector<1x128xf32>
    %31 = vector.shape_cast %30 : vector<1x128xf32> to vector<128xf32>
    %32 = vector.shape_cast %31 : vector<128xf32> to vector<1x128xf32>
    %33 = vector.broadcast %32 : vector<1x128xf32> to vector<16x128xf32>
    %34 = arith.addf %29, %33 : vector<16x128xf32>
    %35 = arith.addf %27, %34 : vector<16x128xf32>
    %cst_20 = arith.constant 0.000000e+00 : f32
    %36 = vector.broadcast %cst_20 : f32 to vector<16x128xf32>
    %37 = arith.maximumf %35, %36 : vector<16x128xf32>
    %c0_21 = arith.constant 0 : index
    %c0_22 = arith.constant 0 : index
    %c0_23 = arith.constant 0 : index
    %38 = vector.load %arg8[%c0_21, %c0_22, %c0_23] : memref<1x16x128xf32, #tpu.memory_space<vmem>>, vector<1x16x128xf32>
    %39 = vector.shape_cast %38 : vector<1x16x128xf32> to vector<16x128xf32>
    %40 = vector.shape_cast %37 : vector<16x128xf32> to vector<1x16x128xf32>
    tpu.vector_store %arg8[%c0_21, %c0_22, %c0_23], %40 {strides = array<i32>} : memref<1x16x128xf32, #tpu.memory_space<vmem>>, vector<1x16x128xf32>,
    return
  }
  func.func @transform_0(%arg0: i32) -> (i32, i32, i32) {
    %c0_i32 = arith.constant 0 : i32
    %c0_i32_0 = arith.constant 0 : i32
    %c0_i32_1 = arith.constant 0 : i32
    return %arg0, %c0_i32, %c0_i32_0 : i32, i32, i32
  }
  func.func @transform_1(%arg0: i32) -> (i32, i32) {
    %c0_i32 = arith.constant 0 : i32
    %c0_i32_0 = arith.constant 0 : i32
    %c0_i32_1 = arith.constant 0 : i32
    return %c0_i32, %c0_i32_0 : i32, i32
  }
  func.func @transform_2(%arg0: i32) -> (i32, i32) {
    %c0_i32 = arith.constant 0 : i32
    %c0_i32_0 = arith.constant 0 : i32
    %c0_i32_1 = arith.constant 0 : i32
    return %c0_i32, %c0_i32_0 : i32, i32
  }
  func.func @transform_3(%arg0: i32) -> (i32, i32) {
    %c0_i32 = arith.constant 0 : i32
    %c0_i32_0 = arith.constant 0 : i32
    %c0_i32_1 = arith.constant 0 : i32
    return %c0_i32, %c0_i32_0 : i32, i32
  }
  func.func @transform_4(%arg0: i32) -> (i32, i32) {
    %c0_i32 = arith.constant 0 : i32
    %c0_i32_0 = arith.constant 0 : i32
    %c0_i32_1 = arith.constant 0 : i32
    return %c0_i32, %c0_i32_0 : i32, i32
  }
  func.func @transform_5(%arg0: i32) -> (i32, i32) {
    %c0_i32 = arith.constant 0 : i32
    %c0_i32_0 = arith.constant 0 : i32
    %c0_i32_1 = arith.constant 0 : i32
    return %c0_i32, %c0_i32_0 : i32, i32
  }
  func.func @transform_6(%arg0: i32) -> (i32, i32) {
    %c0_i32 = arith.constant 0 : i32
    %c0_i32_0 = arith.constant 0 : i32
    %c0_i32_1 = arith.constant 0 : i32
    return %c0_i32, %c0_i32_0 : i32, i32
  }
  func.func @transform_7(%arg0: i32) -> (i32, i32, i32) {
    %c0_i32 = arith.constant 0 : i32
    %c0_i32_0 = arith.constant 0 : i32
    %c0_i32_1 = arith.constant 0 : i32
    return %arg0, %c0_i32, %c0_i32_0 : i32, i32, i32
  }
}

</mosaic_0001>

<bundles_post_ra>
// kernel: tpu_custom_call.1
= control target key start
LH: loop header
LB: loop body
LE: loop exit
PB: predicated region body
PF: predicated region fallthrough
CT: control target
= control target key end

     0   :  { %s1280_s0 = inlined_call_operand.hbm [shape: f32[2,16,128], index: 0, kind: input, shape index: {}]   ;;  %s1281_s1 = inlined_call_operand.hbm [shape: f32[256,128], index: 1, kind: input, shape index: {}]   ;;  %s1282_s2 = inlined_call_operand.vmem [shape: f32[1,128], index: 2, kind: input, shape index: {}]   ;;  %s1283_s3 = inlined_call_operand.hbm [shape: f32[256,128], index: 3, kind: input, shape index: {}]   ;;  %s1284_s4 = inlined_call_operand.vmem [shape: f32[1,128], index: 4, kind: input, shape index: {}]   ;;  %s1285_s5 = inlined_call_operand.hbm [shape: f32[128,128], index: 5, kind: input, shape index: {}]   ;;  %s1286_s6 = inlined_call_operand.vmem [shape: f32[1,128], index: 6, kind: input, shape index: {}]   ;;  %s1287_s7 = inlined_call_operand.hbm [shape: f32[2,16,128], index: 7, kind: output, shape index: {}]  }
   0x1   :  { %1290 = sst [smem:[#allocation15_spill]] %s1281_s1 }
   0x2   :  { %12 = vsyncpa [#allocation3], 0 }
   0x3   :  { %14 = vsyncpa [#allocation3 + $0x1], 0 }
   0x4   :  { %15 = vsyncpa [#allocation6], 0 }
   0x5   :  { %16 = vsyncpa [#allocation9], 0 }
   0x6   :  { %17 = vsyncpa [#allocation4], 0 }
   0x7   :  { %19 = vsyncpa [#allocation4 + $0x1], 0  ;;  %s1072_s24 = smov 0   ;;  %s1074_s25 = smov 0  }
   0x8   :  { %s1076_s26 = smov 0   ;;  %s1078_s27 = smov 0  }
   0x9 LB: > { %s1093_s28 = sadd.s32 4294967295, %s1023_s27   ;;  %s703_s29 = sadd.s32 4294967294, %s1023_s27   ;;  %s1023_s27 = sphi %s1078_s27, %s1306_s27   ;;  %s1019_s26 = sphi %s1076_s26, %s1305_s26   ;;  %s1015_s25 = sphi %s1074_s25, %s1304_s25   ;;  %s1011_s24 = sphi %s1072_s24, %s1303_s24  }
   0xa   : > { %p45_p0 = scmp.ne.s32.totalorder %s1015_s25, %s1011_s24  ;;  %p46_p1 = scmp.eq.s32.totalorder %s1093_s28, 0 }
   0xb   : > { %p195_p2 = scmp.eq.s32.totalorder %s1093_s28, 1  ;;  %p201_p3 = scmp.eq.s32.totalorder %s703_s29, 1 }
   0xc   : > { %p1102_p4 = por %p46_p1, %p45_p0  ;;  %p704_p5 = scmp.ge.s32.totalorder %s1023_s27, 1 }
   0xd   : > { %p1107_p6 = por %p201_p3, %p45_p0  ;;  %p208_p7 = scmp.lt.s32.totalorder %s1023_s27, 3 }
   0xe   : > { %s1293_s1 = sld [smem:[#allocation15_spill]]  ;;  %s1025_s13 = smov [#allocation5]  }
   0xf   : > { %p1115_p8 = pnand %p704_p5, %p208_p7  ;;  %s221_s14 = sshll.u32 %s1025_s13, 4  ;;  %s222_s14 = int_to_ptr.vmem [resolvable:$true] %s221_s14 }
  0x10   : > { %s236_s18 = sshll.u32 %s1283_s3, 4  ;;  %s1288_s19 = smov 128   ;;  %s237_s18 = int_to_ptr.hbm [resolvable:$true] %s236_s18 }
  0x11   : > { %p761_p9 = pneg %p1115_p8  ;;  %s1289_s20 = smov 8  }
  0x12   : > { %s1028_s21 = smov [#allocation7]   ;;  %s253_s9 = sshll.u32 %s1285_s5, 4  ;;  %s254_s9 = int_to_ptr.hbm [resolvable:$true] %s253_s9 }
  0x13   : > { %p1123_p10 = pnand %p761_p9, %p46_p1  ;;  %s238_s22 = sshll.u32 %s1028_s21, 4  ;;  %s239_s22 = int_to_ptr.vmem [resolvable:$true] %s238_s22 }
  0x14   : > { %s219_s11 = sshll.u32 %s1293_s1, 4  ;;  %s1029_s10 = smov [#allocation8]   ;;  %s220_s11 = int_to_ptr.hbm [resolvable:$true] %s219_s11 }
  0x15   : > { %764 = dma.hbm_to_vmem [thread:$0]  (!%p1123_p10), %s220_s11, 4096, %s222_s14, [#allocation6], %s1288_s19, %s1288_s19, %s1289_s20  }
  0x16   : > { %767 = dma.hbm_to_vmem [thread:$0]  (!%p1123_p10), %s237_s18, 4096, %s239_s22, [#allocation6], %s1288_s19, %s1288_s19, %s1289_s20  }
  0x17   : > { %s255_s11 = sshll.u32 %s1029_s10, 4  ;;  %s1145_s13 = sadd.s32 1, %s1023_s27   ;;  %s256_s11 = int_to_ptr.vmem [resolvable:$true] %s255_s11 }
  0x18   : > { %770 = dma.hbm_to_vmem [thread:$0]  (!%p1123_p10), %s254_s9, 2048, %s256_s11, [#allocation9], %s1288_s19, %s1288_s19, %s1289_s20  }
  0x19   : > { %s29_s14 = ssub.s32 %s1023_s27, %s1145_s13  ;;  %s32_s16 = sadd.s32 1, %s1019_s26 }
  0x1a   : > { %p30_p12 = scmp.eq.s32.totalorder %s29_s14, 0  ;;  %p39_p13 = scmp.ne.s32.totalorder %s1019_s26, %s1015_s25 }
  0x1b   : > { %p40_p0 = scmp.eq.s32.totalorder %s1023_s27, 0  ;;  %p782_p5 = scmp.lt.s32.totalorder %s1023_s27, 2 }
  0x1c   : > { %s1159_s17 = scalar_select %p30_p12, %s1019_s26, %s32_s16  }
  0x1d   : > { %p1163_p3 = por %p195_p2, %p39_p13  ;;  %s272_s21 = sand.u32 1, %s1019_s26  }
  0x1e   : > { %s727_s15 = sshll.u32 %s1023_s27, 4  ;;  %p41_p7 = por %p40_p0, %p39_p13 }
  0x1f   : > { %s709_s22 = sshll.u32 %s272_s21, 4  ;;  %s281_s9 = scalar_lea.hbm %s1280_s0, %s727_s15 }
  0x20   : > { %s282_s10 = sshll.u32 %s281_s9, 4  ;;  %s276_s11 = scalar_lea.vmem [#allocation2], %s709_s22  ;;  %s283_s10 = int_to_ptr.hbm [resolvable:$true] %s282_s10 }
  0x21   : > { %s284_s14 = sshll.u32 %s276_s11, 4  ;;  %p1173_p9 = pnand %p782_p5, %p41_p7  ;;  %s285_s14 = int_to_ptr.vmem [resolvable:$true] %s284_s14 }
  0x22   : > { %s273_s19 = scalar_lea.sflag [#allocation3], %s272_s21  ;;  %s919_s20 = sshra.s32 %s283_s10, 4  ;;  %s920_s20 = int_to_ptr.hbm [resolvable:$true] %s919_s20 }
  0x23   : > { %s921_s1 = scalar_lea.hbm %s920_s20, 16  ;;  %p923_p10 = pneg %p1173_p9 }
  0x24   : > { %p922_p2 = scmp.ne.s32.totalorder %s920_s20, %s921_s1  ;;  %s926_s22 = scalar_lea.hbm %s1280_s0, 32 }
  0x25   : > { %p927_p0 = scmp.lt.s32.totalorder %s920_s20, %s1280_s0  ;;  %p928_p5 = scmp.lt.s32.totalorder %s926_s22, %s921_s1 }
  0x26   : > { %p924_p12 = pnand %p923_p10, %p922_p2 }
  0x27   : > { %p929_p7 = por %p928_p5, %p927_p0 }
  0x28   : > { %p925_p13 = pneg %p924_p12 }
  0x2a   : > { %p930_p11 = pnand %p929_p7, %p925_p13 }
  0x2c   : > { %933 = shalt.err (!%p930_p11)
}
  0x2d   : > { %s1298_s21 = smov 8   ;;  %s1299_s11 = smov 128  }
  0x2e   : > { %774 = dma.hbm_to_vmem [thread:$0]  (!%p1173_p9), %s283_s10, 256, %s285_s14, %s273_s19, %s1299_s11, %s1299_s11, %s1298_s21  }
  0x2f   : > { %296 = sbr.rel (%p1115_p8) target bundleno = 376 (0x178), region = 48  ;;  %s1193_s15 = sand.u32 (!%p1115_p8), 1, %s1015_s25  }
  0x30   : > { %s713_s1 = sshll.u32 (!%p1115_p8), %s1193_s15, 4  ;;  %s299_s20 = scalar_lea.sflag (!%p1115_p8), [#allocation3], %s1193_s15 }
  0x31   : > { %s1199_s23 = scalar_lea.vmem (!%p1115_p8), [#allocation2], %s713_s1 }
  0x34   : > { %994 = dma.done.wait (%p1102_p4), %s299_s20, 256  }
  0x35   : > { %996 = vsyncadd (%p1102_p4), %s299_s20, 4294967040 }
  0x36   : > { %998 = dma.done.wait (%p46_p1), [#allocation6], 8192  }
  0x37   : > { %1000 = vsyncadd (%p46_p1), [#allocation6], 4294959104 }
  0x38   : > { %1002 = dma.done.wait (%p46_p1), [#allocation9], 2048  }
  0x39   : > { %1004 = vsyncadd (%p46_p1), [#allocation9], 4294965248  ;;  %v375_v0 = vld [vmem:[#allocation5 + $0x78] sm:$0xff]  ;;  %v374_v1 = vld [vmem:[#allocation5 + $0x70] sm:$0xff]  ;;  %vm353_vm0 = vcmask 1040384   ;;  %s728_s22 = sshll.u32 %s1093_s28, 4 }
  0x3a   : > { %v391_v2 = vld [vmem:[#allocation5 + $0xf8] sm:$0xff]  ;;  %396 = vmatpush.msra.mxu0 %v375_v0  ;;  %v390_v3 = vld [vmem:[#allocation5 + $0xf0] sm:$0xff]  ;;  %v373_v4 = vld [vmem:[#allocation5 + $0x68] sm:$0xff]  ;;  %s348_s29 = scalar_lea.vmem [#allocation10], %s713_s1  ;;  %s597_s11 = scalar_lea.hbm %s1287_s7, %s728_s22 }
  0x3b   : > { %419 = vmatpush.msra.mxu1 %v391_v2  ;;  %v389_v5 = vld [vmem:[#allocation5 + $0xe8] sm:$0xff]  ;;  %v372_v6 = vld [vmem:[#allocation5 + $0x60] sm:$0xff]  ;;  %v371_v8 = vld [vmem:[#allocation5 + $0x58] sm:$0xff]  ;;  %s598_s20 = sshll.u32 %s348_s29, 4  ;;  %s586_s28 = scalar_lea.sflag [#allocation4], %s1193_s15  ;;  %s599_s20 = int_to_ptr.vmem [resolvable:$true] %s598_s20 }
  0x3c   : > { %397 = vmatpush.msra.mxu0 %v374_v1  ;;  %v388_v7 = vld [vmem:[#allocation5 + $0xe0] sm:$0xff]  ;;  %v387_v9 = vld [vmem:[#allocation5 + $0xd8] sm:$0xff]  ;;  %v370_v10 = vld [vmem:[#allocation5 + $0x50] sm:$0xff]  ;;  %s969_s10 = scalar_lea.hbm %s1287_s7, 32 }
  0x3d   : > { %420 = vmatpush.msra.mxu1 %v390_v3  ;;  %v386_v11 = vld [vmem:[#allocation5 + $0xd0] sm:$0xff]  ;;  %v369_v12 = vld [vmem:[#allocation5 + $0x48] sm:$0xff]  ;;  %v368_v14 = vld [vmem:[#allocation5 + $0x40] sm:$0xff] }
  0x3e   : > { %398 = vmatpush.msra.mxu0 %v373_v4  ;;  %v385_v13 = vld [vmem:[#allocation5 + $0xc8] sm:$0xff]  ;;  %v467_v15 = vld [vmem:[#allocation7 + $0x78] sm:$0xff]  ;;  %v384_v16 = vld [vmem:[#allocation5 + $0xc0] sm:$0xff] }
  0x3f   : > { %421 = vmatpush.msra.mxu1 %v389_v5  ;;  %488 = vmatpush.msra.mxu2 %v467_v15  ;;  %v466_v17 = vld [vmem:[#allocation7 + $0x70] sm:$0xff]  ;;  %v483_v18 = vld [vmem:[#allocation7 + $0xf8] sm:$0xff]  ;;  %v465_v19 = vld [vmem:[#allocation7 + $0x68] sm:$0xff] }
  0x40   : > { %399 = vmatpush.msra.mxu0 %v372_v6  ;;  %v482_v20 = vld [vmem:[#allocation7 + $0xf0] sm:$0xff]  ;;  %v367_v21 = vld [vmem:[#allocation5 + $0x38] sm:$0xff]  ;;  %511 = vmatpush.msra.mxu3 %v483_v18  ;;  %v464_v23 = vld [vmem:[#allocation7 + $0x60] sm:$0xff] }
  0x41   : > { %422 = vmatpush.msra.mxu1 %v388_v7  ;;  %v383_v22 = vld [vmem:[#allocation5 + $0xb8] sm:$0xff]  ;;  %489 = vmatpush.msra.mxu2 %v466_v17  ;;  %v481_v24 = vld [vmem:[#allocation7 + $0xe8] sm:$0xff]  ;;  %v366_v25 = vld [vmem:[#allocation5 + $0x30] sm:$0xff] }
  0x42   : > { %400 = vmatpush.msra.mxu0 %v371_v8  ;;  %v382_v26 = vld [vmem:[#allocation5 + $0xb0] sm:$0xff]  ;;  %512 = vmatpush.msra.mxu3 %v482_v20  ;;  %v463_v27 = vld [vmem:[#allocation7 + $0x58] sm:$0xff]  ;;  %v480_v28 = vld [vmem:[#allocation7 + $0xe0] sm:$0xff] }
  0x43   : > { %423 = vmatpush.msra.mxu1 %v387_v9  ;;  %490 = vmatpush.msra.mxu2 %v465_v19  ;;  %v365_v29 = vld [vmem:[#allocation5 + $0x28] sm:$0xff]  ;;  %v462_v31 = vld [vmem:[#allocation7 + $0x50] sm:$0xff]  ;;  %v479_v32 = vld [vmem:[#allocation7 + $0xd8] sm:$0xff] }
  0x44   : > { %401 = vmatpush.msra.mxu0 %v370_v10  ;;  %v381_v30 = vld [vmem:[#allocation5 + $0xa8] sm:$0xff]  ;;  %513 = vmatpush.msra.mxu3 %v481_v24  ;;  %v364_v33 = vld [vmem:[#allocation5 + $0x20] sm:$0xff]  ;;  %v363_v34 = vld [vmem:[#allocation5 + $0x18] sm:$0xff] }
  0x45   : > { %424 = vmatpush.msra.mxu1 %v386_v11  ;;  %491 = vmatpush.msra.mxu2 %v464_v23  ;;  %v380_v35 = vld [vmem:[#allocation5 + $0xa0] sm:$0xff]  ;;  %v461_v36 = vld [vmem:[#allocation7 + $0x48] sm:$0xff]  ;;  %v478_v37 = vld [vmem:[#allocation7 + $0xd0] sm:$0xff] }
  0x46   : > { %402 = vmatpush.msra.mxu0 %v369_v12  ;;  %514 = vmatpush.msra.mxu3 %v480_v28  ;;  %v379_v38 = vld [vmem:[#allocation5 + $0x98] sm:$0xff]  ;;  %v460_v39 = vld [vmem:[#allocation7 + $0x40] sm:$0xff]  ;;  %v477_v40 = vld [vmem:[#allocation7 + $0xc8] sm:$0xff] }
  0x47   : > { %425 = vmatpush.msra.mxu1 %v385_v13  ;;  %492 = vmatpush.msra.mxu2 %v463_v27  ;;  %v362_v41 = vld [vmem:[#allocation5 + $0x10] sm:$0xff]  ;;  %v459_v44 = vld [vmem:[#allocation7 + $0x38] sm:$0xff]  ;;  %v476_v45 = vld [vmem:[#allocation7 + $0xc0] sm:$0xff] }
  0x48   : > { %403 = vmatpush.msra.mxu0 %v368_v14  ;;  %515 = vmatpush.msra.mxu3 %v479_v32  ;;  %v378_v42 = vld [vmem:[#allocation5 + $0x90] sm:$0xff]  ;;  %v361_v46 = vld [vmem:[#allocation5 + $0x8] sm:$0xff]  ;;  %v475_v49 = vld [vmem:[#allocation7 + $0xb8] sm:$0xff] }
  0x49   : > { %426 = vmatpush.msra.mxu1 %v384_v16  ;;  %493 = vmatpush.msra.mxu2 %v462_v31  ;;  %v1214_v43 = vld [vmem:[%s1199_s23] sm:$0xff]  ;;  %v377_v47 = vld [vmem:[#allocation5 + $0x88] sm:$0xff]  ;;  %vm1218_vm1 = vmneg %vm353_vm0 }
  0x4a   : > { %404 = vmatpush.msra.mxu0 %v367_v21  ;;  %516 = vmatpush.msra.mxu3 %v478_v37  ;;  %v458_v48 = vld [vmem:[#allocation7 + $0x30] sm:$0xff]  ;;  %v360_v50 = vld [vmem:[#allocation5] sm:$0xff]  ;;  %v354_v52 = vrot.slane %v1214_v43, 7  ;;  %v1223_v54 = vld [vmem:[%s1199_s23 + $0x8] sm:$0xff]  ;;  %s600_s23 = sshll.u32 %s597_s11, 4  ;;  %s601_s23 = int_to_ptr.hbm [resolvable:$true] %s600_s23 }
  0x4b   : > { %427 = vmatpush.msra.mxu1 %v383_v22  ;;  %494 = vmatpush.msra.mxu2 %v461_v36  ;;  %v376_v51 = vld [vmem:[#allocation5 + $0x80] sm:$0xff]  ;;  %v551_v55 = vld [vmem:[#allocation8 + $0x78] sm:$0xff]  ;;  %v457_v56 = vld [vmem:[#allocation7 + $0x28] sm:$0xff]  ;;  %v355_v59 = vrot.slane %v1223_v54, 7  ;;  %s963_s30 = sshra.s32 %s601_s23, 4  ;;  %s964_s30 = int_to_ptr.hbm [resolvable:$true] %s963_s30 }
  0x4c   : > { %405 = vmatpush.msra.mxu0 %v366_v25  ;;  %517 = vmatpush.msra.mxu3 %v477_v40  ;;  %v474_v57 = vld [vmem:[#allocation7 + $0xb0] sm:$0xff]  ;;  %v456_v60 = vld [vmem:[#allocation7 + $0x20] sm:$0xff]  ;;  %v473_v61 = vld [vmem:[#allocation7 + $0xa8] sm:$0xff]  ;;  %s965_s1 = scalar_lea.hbm %s964_s30, 16  ;;  %p970_p11 = scmp.lt.s32.totalorder %s964_s30, %s1287_s7 }
  0x4d   : > { %428 = vmatpush.msra.mxu1 %v382_v26  ;;  %495 = vmatpush.msra.mxu2 %v460_v39  ;;  %v550_v58 = vld [vmem:[#allocation8 + $0x70] sm:$0xff]  ;;  %v549_v62 = vld [vmem:[#allocation8 + $0x68] sm:$0xff]  ;;  %v548_v63 = vld [vmem:[#allocation8 + $0x60] sm:$0xff]  ;;  %v356_v0 = vsel %vm353_vm0, %v354_v52, %v355_v59  ;;  %p966_p1 = scmp.ne.s32.totalorder %s964_s30, %s965_s1  ;;  %p971_p9 = scmp.lt.s32.totalorder %s969_s10, %s965_s1 }
  0x4e   : > { %406 = vmatpush.msra.mxu0 %v365_v29  ;;  %518 = vmatpush.msra.mxu3 %v476_v45  ;;  %v547_v1 = vld [vmem:[#allocation8 + $0x58] sm:$0xff]  ;;  %v546_v2 = vld [vmem:[#allocation8 + $0x50] sm:$0xff]  ;;  %v545_v3 = vld [vmem:[#allocation8 + $0x48] sm:$0xff] }
  0x4f   : > { %429 = vmatpush.msra.mxu1 %v381_v30  ;;  %496 = vmatpush.msra.mxu2 %v459_v44  ;;  %v455_v4 = vld [vmem:[#allocation7 + $0x18] sm:$0xff]  ;;  %v472_v5 = vld [vmem:[#allocation7 + $0xa0] sm:$0xff]  ;;  %v454_v7 = vld [vmem:[#allocation7 + $0x10] sm:$0xff]  ;;  %p967_p4 = pnand %p966_p1, %p1163_p3  ;;  %p972_p2 = por %p971_p9, %p970_p11 }
  0x50   : > { %407 = vmatpush.msra.mxu0 %v364_v33  ;;  %519 = vmatpush.msra.mxu3 %v475_v49  ;;  %v544_v6 = vld [vmem:[#allocation8 + $0x40] sm:$0xff]  ;;  %v471_v8 = vld [vmem:[#allocation7 + $0x98] sm:$0xff]  ;;  %v453_v10 = vld [vmem:[#allocation7 + $0x8] sm:$0xff] }
  0x51   : > { %430 = vmatpush.msra.mxu1 %v380_v35  ;;  %497 = vmatpush.msra.mxu2 %v458_v48  ;;  %v543_v9 = vld [vmem:[#allocation8 + $0x38] sm:$0xff]  ;;  %v470_v11 = vld [vmem:[#allocation7 + $0x90] sm:$0xff]  ;;  %v452_v13 = vld [vmem:[#allocation7] sm:$0xff]  ;;  %p968_p8 = pneg %p967_p4 }
  0x52   : > { %408 = vmatpush.msra.mxu0 %v363_v34  ;;  %520 = vmatpush.msra.mxu3 %v474_v57  ;;  %v542_v12 = vld [vmem:[#allocation8 + $0x30] sm:$0xff]  ;;  %v469_v14 = vld [vmem:[#allocation7 + $0x88] sm:$0xff]  ;;  %v468_v16 = vld [vmem:[#allocation7 + $0x80] sm:$0xff] }
  0x53   : > { %431 = vmatpush.msra.mxu1 %v379_v38  ;;  %498 = vmatpush.msra.mxu2 %v457_v56  ;;  %v541_v15 = vld [vmem:[#allocation8 + $0x28] sm:$0xff]  ;;  %v540_v17 = vld [vmem:[#allocation8 + $0x20] sm:$0xff]  ;;  %v539_v18 = vld [vmem:[#allocation8 + $0x18] sm:$0xff]  ;;  %p973_p10 = pnand %p972_p2, %p968_p8 }
  0x54   : > { %409 = vmatpush.msra.mxu0 %v362_v41  ;;  %521 = vmatpush.msra.mxu3 %v473_v61  ;;  %v538_v19 = vld [vmem:[#allocation8 + $0x10] sm:$0xff]  ;;  %v537_v20 = vld [vmem:[#allocation8 + $0x8] sm:$0xff]  ;;  %v536_v21 = vld [vmem:[#allocation8] sm:$0xff] }
  0x55   : > { %432 = vmatpush.msra.mxu1 %v378_v42  ;;  %499 = vmatpush.msra.mxu2 %v456_v60  ;;  %v826_v22 = vld [vmem:[%s1282_s2] ss:$0 sm:$0xff] }
  0x56   : > { %410 = vmatpush.msra.mxu0 %v361_v46  ;;  %522 = vmatpush.msra.mxu3 %v472_v5  ;;  %v827_v36 = vld [vmem:[%s1284_s4] ss:$0 sm:$0xff] }
  0x57   : > { %433 = vmatpush.msra.mxu1 %v377_v47  ;;  %500 = vmatpush.msra.mxu2 %v455_v4  ;;  %v828_v37 = vld [vmem:[%s1286_s6] ss:$0 sm:$0xff] }
  0x58   : > { %411 = vmatpush.msra.mxu0 %v360_v50  ;;  %523 = vmatpush.msra.mxu3 %v471_v8 }
  0x59   : > { %434 = vmatpush.msra.mxu1 %v376_v51  ;;  %412 = vmatmul.f32.vlgmr.msra.gmra.mxu0 %v1214_v43 }
  0x5a   : > { %719 = vmatmul.msk.f32.vlgmr.msra.gmra.mxu1 %vm1218_vm1, %v354_v52  ;;  %556 = vmatpush.msrb.mxu0 %v551_v55 }
  0x5b   : > { %729 = vmatpush.msrb.mxu1 %v551_v55  ;;  %501 = vmatpush.msra.mxu2 %v454_v7 }
  0x5c   : > { %557 = vmatpush.msrb.mxu0 %v550_v58  ;;  %524 = vmatpush.msra.mxu3 %v470_v11 }
  0x5d   : > { %730 = vmatpush.msrb.mxu1 %v550_v58  ;;  %502 = vmatpush.msra.mxu2 %v453_v10 }
  0x5e   : > { %558 = vmatpush.msrb.mxu0 %v549_v62  ;;  %525 = vmatpush.msra.mxu3 %v469_v14 }
  0x5f   : > { %731 = vmatpush.msrb.mxu1 %v549_v62  ;;  %503 = vmatpush.msra.mxu2 %v452_v13 }
  0x60   : > { %559 = vmatpush.msrb.mxu0 %v548_v63  ;;  %526 = vmatpush.msra.mxu3 %v468_v16 }
  0x61   : > { %732 = vmatpush.msrb.mxu1 %v548_v63  ;;  %415 = vmatmul.f32.gmra.mxu0 %v1223_v54 }
  0x62   : > { %438 = vmatmul.f32.gmra.mxu1 %v356_v0  ;;  %560 = vmatpush.msrb.mxu0 %v547_v1 }
  0x63   : > { %733 = vmatpush.msrb.mxu1 %v547_v1 }
  0x64   : > { %561 = vmatpush.msrb.mxu0 %v546_v2 }
  0x65   : > { %734 = vmatpush.msrb.mxu1 %v546_v2 }
  0x66   : > { %562 = vmatpush.msrb.mxu0 %v545_v3 }
  0x67   : > { %735 = vmatpush.msrb.mxu1 %v545_v3 }
  0x68   : > { %563 = vmatpush.msrb.mxu0 %v544_v6 }
  0x69   : > { %736 = vmatpush.msrb.mxu1 %v544_v6 }
  0x6a   : > { %564 = vmatpush.msrb.mxu0 %v543_v9 }
  0x6b   : > { %737 = vmatpush.msrb.mxu1 %v543_v9 }
  0x6c   : > { %565 = vmatpush.msrb.mxu0 %v542_v12 }
  0x6d   : > { %738 = vmatpush.msrb.mxu1 %v542_v12 }
  0x6e   : > { %566 = vmatpush.msrb.mxu0 %v541_v15 }
  0x6f   : > { %739 = vmatpush.msrb.mxu1 %v541_v15 }
  0x70   : > { %567 = vmatpush.msrb.mxu0 %v540_v17 }
  0x71   : > { %740 = vmatpush.msrb.mxu1 %v540_v17 }
  0x72   : > { %568 = vmatpush.msrb.mxu0 %v539_v18 }
  0x73   : > { %741 = vmatpush.msrb.mxu1 %v539_v18 }
  0x74   : > { %569 = vmatpush.msrb.mxu0 %v538_v19 }
  0x75   : > { %742 = vmatpush.msrb.mxu1 %v538_v19 }
  0x76   : > { %570 = vmatpush.msrb.mxu0 %v537_v20 }
  0x77   : > { %743 = vmatpush.msrb.mxu1 %v537_v20 }
  0x78   : > { %571 = vmatpush.msrb.mxu0 %v536_v21 }
  0x79   : > { %744 = vmatpush.msrb.mxu1 %v536_v21  ;;  %572 = vmatmul.f32.vlgmr.msrb.gmra.mxu0 %v1214_v43 }
  0x7a   : > { %575 = vmatmul.f32.vlgmr.msrb.gmra.mxu1 %v1223_v54 }
  0xd6   : > { %v413_v23 = vpop.f32.mrf.mxu0 }
  0xd7   : > { %v436_v24 = vpop.f32.mrf.mxu1  ;;  %v414_v25 = vadd.f32 %v826_v22, %v413_v23 }
  0xd9   : > { %v437_v26 = vadd.f32 %v436_v24, %v414_v25 }
  0xdb   : > { %v442_v27 = vmax.f32 %v437_v26, 0.0 }
  0xdd   : > { %v446_v28 = vrot.slane %v442_v27, 7  ;;  %504 = vmatmul.f32.vlgmr.msra.gmra.mxu2 %v442_v27 }
  0xde   : > { %v416_v29 = vpop.f32.mrf.mxu0 }
  0xdf   : > { %v439_v30 = vpop.f32.mrf.mxu1  ;;  %v417_v31 = vadd.f32 %v826_v22, %v416_v29  ;;  %721 = vmatmul.msk.f32.vlgmr.msra.gmra.mxu3 %vm1218_vm1, %v446_v28 }
  0xe1   : > { %v440_v32 = vadd.f32 %v439_v30, %v417_v31 }
  0xe3   : > { %v443_v33 = vmax.f32 %v440_v32, 0.0 }
  0xe5   : > { %v447_v34 = vrot.slane %v443_v33, 7  ;;  %507 = vmatmul.f32.gmra.mxu2 %v443_v33 }
  0xe7   : > { %v448_v35 = vsel %vm353_vm0, %v446_v28, %v447_v34 }
  0xe8   : > { %530 = vmatmul.f32.gmra.mxu3 %v448_v35 }
  0xf6   : > { %v573_v39 = vpop.f32.mrf.mxu0 }
  0xf7   : > { %v574_v43 = vadd.f32 %v828_v37, %v573_v39  ;;  %v576_v49 = vpop.f32.mrf.mxu1 }
  0xf8   : > { %v577_v52 = vadd.f32 %v828_v37, %v576_v49 }
 0x160   : > { %v505_v38 = vpop.f32.mrf.mxu2 }
 0x161   : > { %v506_v40 = vadd.f32 %v827_v36, %v505_v38 }
 0x162   : > { %v528_v41 = vpop.f32.mrf.mxu3 }
 0x163   : > { %v529_v42 = vadd.f32 %v528_v41, %v506_v40 }
 0x165   : > { %v534_v44 = vmax.f32 %v529_v42, 0.0 }
 0x167   : > { %v579_v45 = vadd.f32 %v574_v43, %v534_v44 }
 0x168   : > { %v508_v46 = vpop.f32.mrf.mxu2 }
 0x169   : > { %v581_v47 = vmax.f32 %v579_v45, 0.0  ;;  %v509_v48 = vadd.f32 %v827_v36, %v508_v46 }
 0x16b   : > { %583 = vst [vmem:[%s348_s29] sm:$0xff] %v581_v47  ;;  %v531_v50 = vpop.f32.mrf.mxu3 }
 0x16c   : > { %v532_v51 = vadd.f32 %v531_v50, %v509_v48 }
 0x16e   : > { %v535_v53 = vmax.f32 %v532_v51, 0.0 }
 0x170   : > { %v580_v54 = vadd.f32 %v577_v52, %v535_v53 }
 0x172   : > { %v582_v55 = vmax.f32 %v580_v54, 0.0 }
 0x174   : > { %584 = vst [vmem:[%s348_s29 + $0x8] sm:$0xff] %v582_v55 }
 0x175   : > { %976 = shalt.err (!%p973_p10)
}
 0x176   : > { %s1030_s15 = smov 128   ;;  %s1031_s22 = smov 8  }
 0x177   : > { %759 = dma.vmem_to_hbm [thread:$0]  (%p1163_p3), %s599_s20, 256, %s601_s23, %s586_s28, %s1030_s15, %s1030_s15, %s1031_s22  }
 0x178 PF: > { %s615_s29 = sand.u32 1, %s1011_s24   ;;  %p1302_p12 = scmp.ge.s32.totalorder %s1023_s27, 2 }
 0x179   : > { %s616_s9 = scalar_lea.sflag [#allocation4], %s615_s29 }
 0x17a   : > { %p776_p13 = pnand %p1302_p12, %p1107_p6 }
 0x17c   : > { %p777_p0 = pneg %p776_p13 }
 0x17e   : > { %1006 = dma.done.wait (%p777_p0), %s616_s9, 256  }
 0x17f   : > { %1008 = vsyncadd (%p777_p0), %s616_s9, 4294967040  ;;  %p22_p5 = scmp.ge.s32.totalorder %s1145_s13, 4   ;;  %s1303_s24 = smov %s1015_s25 }
 0x180   : > { %s1304_s25 = smov %s1019_s26  ;;  %s1305_s26 = smov %s1159_s17 }
 0x181   : > { %s1306_s27 = smov %s1145_s13  ;;  %24 = sbr.rel (!%p22_p5) target bundleno = 9 (0x9), region = 105 }
 0x186   :  { %622 = vsyncpa [#allocation3], 1 }
 0x187   :  { %624 = vsyncpa [#allocation3 + $0x1], 1 }
 0x188   :  { %625 = vsyncpa [#allocation6], 1 }
 0x189   :  { %626 = vsyncpa [#allocation9], 1 }
 0x18a   :  { %627 = vsyncpa [#allocation4], 1 }
 0x18b   :  { %629 = vsyncpa [#allocation4 + $0x1], 1 }

</bundles_post_ra>
